<compile_context>
chip_gen: v7x
topology: tpu7x:2x2x1
jax: 0.10.0
libtpu: 0.0.40
codegen_flags: <defaults>
</compile_context>

<pallas_src>
import functools
import math

import jax
import jax.numpy as jnp
from jax.experimental import pallas as pl
from jax.experimental.pallas import tpu as pltpu

_NEG_INF = -9e15  # PyTorch's -9000000000000000.0 sentinel


def _pick_row_tile(n, cap=512):
    # Sublane (second-minor) tile: full extent for small N (always legal),
    # otherwise `cap` (a multiple of 8) with a cdiv grid + masked edge tile.
    return n if n <= cap else cap


def _pick_lane_tile(n, cap=512):
    # Lane (minor) tile: must be a multiple of 128 or the full extent.
    # Cap at 512: 512x512 f32 tiles keep Pass-2 VMEM well under v7x's 64 MiB
    # even with 3 outputs double-buffered (~6.6 MiB).
    if n <= 128:
        return n
    return min(cap, (n // 128) * 128)


# ---- Pass 1: Wh = h @ W ; s1 = sum(Wh*a1, -1) ; s2 = sum(Wh*a2, -1) ----
def _wh_scores_kernel(h_ref, w_ref, a1_ref, a2_ref, wh_ref, s1_ref, s2_ref):
    wh = jnp.dot(h_ref[...], w_ref[...],
                 preferred_element_type=jnp.float32)              # MXU
    wh_ref[...] = wh
    # Lane-oriented VPU/XLU reductions instead of 1-column MXU matvecs.
    s1_ref[...] = jnp.sum(wh * a1_ref[...], axis=-1, keepdims=True)
    s2_ref[...] = jnp.sum(wh * a2_ref[...], axis=-1, keepdims=True)


# ---- Pass 2: tiled (i, j) VPU epilogue over the N x N score matrices ----
def _leaky_scores(s1_ref, s2_ref, alpha):
    pre = s1_ref[...] + s2_ref[...]             # [TI,1] + [1,TJ] -> [TI,TJ]
    return jnp.where(pre > 0, pre, alpha * pre)  # LeakyReLU (VPU)


def _gat_att_only_kernel(s1_ref, s2_ref, mask_ref, att_ref, *, alpha):
    e = _leaky_scores(s1_ref, s2_ref, alpha)
    att_ref[...] = jnp.where(mask_ref[...] > 0, e, _NEG_INF)


def _gat_full_kernel(s1_ref, s2_ref, mask_ref, e_ref, att_ref, tmp_ref, *, alpha):
    e = _leaky_scores(s1_ref, s2_ref, alpha)
    m = mask_ref[...] > 0                       # computed once, reused
    e_ref[...] = e
    att_ref[...] = jnp.where(m, e, _NEG_INF)
    tmp_ref[...] = jnp.where(m, _NEG_INF, e)


def graph_attention_forward(h, adj, W, a, alpha, *, adj_mask=None, emit_aux=True):
    """GraphAttentionLayer forward hot path in two Pallas kernels.

    adj_mask: optional precomputed int8 edge mask (adj > 0).  For real GAT
      usage compute it once per graph and reuse across layers/epochs; if None
      it is derived here (one extra O(N^2) XLA pass).
    emit_aux: if False, only `attention` is produced by Pass 2 (halves its
      HBM traffic); `e` and `tmp_e` are returned as None.
    """
    h = h.astype(jnp.float32)
    W = W.astype(jnp.float32)
    a = a.astype(jnp.float32)

    N, F_in = h.shape
    F_out = W.shape[1]

    if adj_mask is None:
        adj_mask = (adj > 0).astype(jnp.int8)   # 4x smaller Pass-2 read stream

    a1_row = a[:F_out, 0].reshape(1, F_out)
    a2_row = a[F_out:, 0].reshape(1, F_out)

    # ---------- Pass 1: O(N*F) MXU matmul + rank-1 score vectors ----------
    TM = _pick_row_tile(N)
    wh, s1, s2 = pl.pallas_call(
        _wh_scores_kernel,
        out_shape=(
            jax.ShapeDtypeStruct((N, F_out), jnp.float32),   # Wh (unpadded)
            jax.ShapeDtypeStruct((N, 1), jnp.float32),       # s1
            jax.ShapeDtypeStruct((N, 1), jnp.float32),       # s2
        ),
        grid_spec=pltpu.PrefetchScalarGridSpec(
            num_scalar_prefetch=0,
            grid=(pl.cdiv(N, TM),),
            in_specs=[
                pl.BlockSpec((TM, F_in), lambda i: (i, 0)),     # h row tile
                pl.BlockSpec((F_in, F_out), lambda i: (0, 0)),  # W (resident)
                pl.BlockSpec((1, F_out), lambda i: (0, 0)),     # a1 row
                pl.BlockSpec((1, F_out), lambda i: (0, 0)),     # a2 row
            ],
            out_specs=[
                pl.BlockSpec((TM, F_out), lambda i: (i, 0)),
                pl.BlockSpec((TM, 1), lambda i: (i, 0)),
                pl.BlockSpec((TM, 1), lambda i: (i, 0)),
            ],
        ),
        compiler_params=pltpu.CompilerParams(
            dimension_semantics=("parallel",),
            vmem_limit_bytes=32 * 1024 * 1024),
    )(h, W, a1_row, a2_row)

    # Tiny O(N) layout glue: lane-oriented row view of s2 for the column
    # broadcast in Pass 2.  (Emitting it as a row directly from Pass 1 would
    # need an in-kernel (TM,1)->(1,TM) transpose -- not worth the lowering
    # risk for N floats.)
    s2_row = s2.reshape(1, N)

    # ---------- Pass 2: O(N^2) tiled VPU epilogue (HBM-bound) ----------
    TI = _pick_row_tile(N)
    TJ = _pick_lane_tile(N)
    grid2 = (pl.cdiv(N, TI), pl.cdiv(N, TJ))
    in_specs = [
        pl.BlockSpec((TI, 1), lambda i, j: (i, 0)),    # s1 column tile
        pl.BlockSpec((1, TJ), lambda i, j: (0, j)),    # s2 row tile
        pl.BlockSpec((TI, TJ), lambda i, j: (i, j)),   # int8 edge-mask tile
    ]
    out_spec = pl.BlockSpec((TI, TJ), lambda i, j: (i, j))
    # Both axes independent -> shard across v7x's 2 TensorCores (needs >=2
    # blocks per axis, true for real graph sizes); no-op on v5e/v6e.
    cparams = pltpu.CompilerParams(
        dimension_semantics=("parallel", "parallel"),
        vmem_limit_bytes=32 * 1024 * 1024)

    if emit_aux:
        e, attention, tmp_e = pl.pallas_call(
            functools.partial(_gat_full_kernel, alpha=alpha),
            out_shape=(jax.ShapeDtypeStruct((N, N), jnp.float32),) * 3,
            grid_spec=pltpu.PrefetchScalarGridSpec(
                num_scalar_prefetch=0, grid=grid2,
                in_specs=in_specs, out_specs=[out_spec] * 3),
            compiler_params=cparams,
        )(s1, s2_row, adj_mask)
    else:
        attention = pl.pallas_call(
            functools.partial(_gat_att_only_kernel, alpha=alpha),
            out_shape=jax.ShapeDtypeStruct((N, N), jnp.float32),
            grid_spec=pltpu.PrefetchScalarGridSpec(
                num_scalar_prefetch=0, grid=grid2,
                in_specs=in_specs, out_specs=out_spec),
            compiler_params=cparams,
        )(s1, s2_row, adj_mask)
        e = None
        tmp_e = None

    # Side effect from the torch forward: global tmp_matrix = -9e15*ones(N,M,3)
    # (pure constant fill -> plain-JAX glue, nothing to compute on-chip).
    M = 10
    tmp_matrix = jnp.full((N, M, 3), _NEG_INF, dtype=jnp.float32)

    return wh, e, attention, tmp_e, tmp_matrix


def _xavier_uniform(key, shape, gain):
    fan_in, fan_out = shape[0], shape[1]
    bound = gain * math.sqrt(6.0 / (fan_in + fan_out))
    return jax.random.uniform(key, shape, jnp.float32, minval=-bound, maxval=bound)


def _reference(h, adj, W, a, alpha):
    """Pure-JAX reference for correctness checking."""
    h = h.astype(jnp.float32)
    F_out = W.shape[1]
    Wh = h @ W
    Wh1 = Wh @ a[:F_out, :]
    Wh2 = Wh @ a[F_out:, :]
    pre = Wh1 + Wh2.T
    e = jnp.where(pre > 0, pre, alpha * pre)
    zero_vec = _NEG_INF * jnp.ones_like(e)
    attention = jnp.where(adj > 0, e, zero_vec)
    tmp_e = jnp.where(adj > 0, zero_vec, e)
    return Wh, e, attention, tmp_e


if __name__ == "__main__":
    key = jax.random.PRNGKey(0)

    def run_case(case_key, N, F_in, F_out, alpha=0.2, gain=1.414):
        k_h, k_adj, k_W, k_a = jax.random.split(case_key, 4)
        h = jax.random.normal(k_h, (N, F_in), jnp.float32)
        adj = (jax.random.uniform(k_adj, (N, N)) > 0.5).astype(jnp.float32)
        W = _xavier_uniform(k_W, (F_in, F_out), gain)
        a = _xavier_uniform(k_a, (2 * F_out, 1), gain)

        # Edge mask computed once per graph and reused (amortized, as in GAT).
        adj_mask = (adj > 0).astype(jnp.int8)

        # Full-fidelity path (all forward tensors).
        wh, e, attention, tmp_e, tmp_matrix = graph_attention_forward(
            h, adj, W, a, alpha, adj_mask=adj_mask, emit_aux=True)
        jax.block_until_ready((wh, e, attention, tmp_e, tmp_matrix))

        # Bandwidth-optimized path (attention only).
        wh2, _, att2, _, _ = graph_attention_forward(
            h, adj, W, a, alpha, adj_mask=adj_mask, emit_aux=False)
        jax.block_until_ready((wh2, att2))

        wh_r, e_r, att_r, tmp_e_r = _reference(h, adj, W, a, alpha)
        assert jnp.allclose(wh, wh_r, atol=1e-4, rtol=1e-4)
        assert jnp.allclose(e, e_r, atol=1e-4, rtol=1e-4)
        assert jnp.allclose(attention, att_r, atol=1e-4, rtol=1e-4)
        assert jnp.allclose(tmp_e, tmp_e_r, atol=1e-4, rtol=1e-4)
        assert jnp.allclose(wh2, wh_r, atol=1e-4, rtol=1e-4)
        assert jnp.allclose(att2, att_r, atol=1e-4, rtol=1e-4)
        assert tmp_matrix.shape == (N, 10, 3)

    k1, k2 = jax.random.split(key)
    # Small module-like shapes (full-extent blocks, 1x1 grid).
    run_case(k1, N=8, F_in=16, F_out=32)
    # Unaligned N: exercises cdiv grid + masked edge tiles, no pad/slice copies.
    run_case(k2, N=300, F_in=48, F_out=24)

    print("KERNEL_OK")
</pallas_src>

<mosaic_0001>
module attributes {stable_mosaic.version = 11 : i64} {
  func.func @_wh_scores_kernel(%arg0: i32, %arg1: memref<8x16xf32, #tpu.memory_space<vmem>>, %arg2: memref<16x32xf32, #tpu.memory_space<vmem>>, %arg3: memref<1x32xf32, #tpu.memory_space<vmem>>, %arg4: memref<1x32xf32, #tpu.memory_space<vmem>>, %arg5: memref<8x32xf32, #tpu.memory_space<vmem>>, %arg6: memref<8x1xf32, #tpu.memory_space<vmem>>, %arg7: memref<8x1xf32, #tpu.memory_space<vmem>>) attributes {dimension_semantics = [#tpu.dimension_semantics<parallel>], iteration_bounds = array<i64: 1>, scalar_prefetch = 0 : i64, scratch_operands = 0 : i64, tpu.core_type = #tpu.core_type<tc>, window_params = [{transform_indices = @transform_0, window_bounds = array<i64: 8, 16>}, {pipeline_mode = #tpu.pipeline_mode<synchronous>, transform_indices = @transform_1, window_bounds = array<i64: 16, 32>}, {pipeline_mode = #tpu.pipeline_mode<synchronous>, transform_indices = @transform_2, window_bounds = array<i64: 1, 32>}, {pipeline_mode = #tpu.pipeline_mode<synchronous>, transform_indices = @transform_3, window_bounds = array<i64: 1, 32>}, {transform_indices = @transform_4, window_bounds = array<i64: 8, 32>}, {transform_indices = @transform_5, window_bounds = array<i64: 8, 1>}, {transform_indices = @transform_6, window_bounds = array<i64: 8, 1>}]} {
    %c0 = arith.constant 0 : index
    %c0_0 = arith.constant 0 : index
    %0 = vector.load %arg1[%c0, %c0_0] : memref<8x16xf32, #tpu.memory_space<vmem>>, vector<8x16xf32>
    %c0_1 = arith.constant 0 : index
    %c0_2 = arith.constant 0 : index
    %1 = vector.load %arg2[%c0_1, %c0_2] : memref<16x32xf32, #tpu.memory_space<vmem>>, vector<16x32xf32>
    %cst = arith.constant dense<0.000000e+00> : vector<8x32xf32>
    %2 = tpu.matmul %0, %1, %cst {dimension_numbers = #tpu.dot_dimension_numbers<[1], [0], [0], [1], [0, 0, 1, 1], [], []>} : vector<8x16xf32>, vector<16x32xf32>, vector<8x32xf32> -> vector<8x32xf32>
    %c0_3 = arith.constant 0 : index
    %c0_4 = arith.constant 0 : index
    %3 = vector.load %arg5[%c0_3, %c0_4] : memref<8x32xf32, #tpu.memory_space<vmem>>, vector<8x32xf32>
    tpu.vector_store %arg5[%c0_3, %c0_4], %2 {strides = array<i32>} : memref<8x32xf32, #tpu.memory_space<vmem>>, vector<8x32xf32>,
    %c0_5 = arith.constant 0 : index
    %c0_6 = arith.constant 0 : index
    %4 = vector.load %arg3[%c0_5, %c0_6] : memref<1x32xf32, #tpu.memory_space<vmem>>, vector<1x32xf32>
    %5 = vector.broadcast %4 : vector<1x32xf32> to vector<8x32xf32>
    %6 = arith.mulf %2, %5 : vector<8x32xf32>
    %cst_7 = arith.constant dense<0.000000e+00> : vector<8xf32>
    %7 = vector.multi_reduction <add>, %6, %cst_7 [1] : vector<8x32xf32> to vector<8xf32>
    %8 = vector.shape_cast %7 : vector<8xf32> to vector<8x1xf32>
    %c0_8 = arith.constant 0 : index
    %c0_9 = arith.constant 0 : index
    %9 = vector.load %arg6[%c0_8, %c0_9] : memref<8x1xf32, #tpu.memory_space<vmem>>, vector<8x1xf32>
    tpu.vector_store %arg6[%c0_8, %c0_9], %8 {strides = array<i32>} : memref<8x1xf32, #tpu.memory_space<vmem>>, vector<8x1xf32>,
    %c0_10 = arith.constant 0 : index
    %c0_11 = arith.constant 0 : index
    %10 = vector.load %arg4[%c0_10, %c0_11] : memref<1x32xf32, #tpu.memory_space<vmem>>, vector<1x32xf32>
    %11 = vector.broadcast %10 : vector<1x32xf32> to vector<8x32xf32>
    %12 = arith.mulf %2, %11 : vector<8x32xf32>
    %cst_12 = arith.constant dense<0.000000e+00> : vector<8xf32>
    %13 = vector.multi_reduction <add>, %12, %cst_12 [1] : vector<8x32xf32> to vector<8xf32>
    %14 = vector.shape_cast %13 : vector<8xf32> to vector<8x1xf32>
    %c0_13 = arith.constant 0 : index
    %c0_14 = arith.constant 0 : index
    %15 = vector.load %arg7[%c0_13, %c0_14] : memref<8x1xf32, #tpu.memory_space<vmem>>, vector<8x1xf32>
    tpu.vector_store %arg7[%c0_13, %c0_14], %14 {strides = array<i32>} : memref<8x1xf32, #tpu.memory_space<vmem>>, vector<8x1xf32>,
    return
  }
  func.func @transform_0(%arg0: i32) -> (i32, i32) {
    %c0_i32 = arith.constant 0 : i32
    %c0_i32_0 = arith.constant 0 : i32
    return %arg0, %c0_i32 : i32, i32
  }
  func.func @transform_1(%arg0: i32) -> (i32, i32) {
    %c0_i32 = arith.constant 0 : i32
    %c0_i32_0 = arith.constant 0 : i32
    %c0_i32_1 = arith.constant 0 : i32
    return %c0_i32, %c0_i32_0 : i32, i32
  }
  func.func @transform_2(%arg0: i32) -> (i32, i32) {
    %c0_i32 = arith.constant 0 : i32
    %c0_i32_0 = arith.constant 0 : i32
    %c0_i32_1 = arith.constant 0 : i32
    return %c0_i32, %c0_i32_0 : i32, i32
  }
  func.func @transform_3(%arg0: i32) -> (i32, i32) {
    %c0_i32 = arith.constant 0 : i32
    %c0_i32_0 = arith.constant 0 : i32
    %c0_i32_1 = arith.constant 0 : i32
    return %c0_i32, %c0_i32_0 : i32, i32
  }
  func.func @transform_4(%arg0: i32) -> (i32, i32) {
    %c0_i32 = arith.constant 0 : i32
    %c0_i32_0 = arith.constant 0 : i32
    return %arg0, %c0_i32 : i32, i32
  }
  func.func @transform_5(%arg0: i32) -> (i32, i32) {
    %c0_i32 = arith.constant 0 : i32
    %c0_i32_0 = arith.constant 0 : i32
    return %arg0, %c0_i32 : i32, i32
  }
  func.func @transform_6(%arg0: i32) -> (i32, i32) {
    %c0_i32 = arith.constant 0 : i32
    %c0_i32_0 = arith.constant 0 : i32
    return %arg0, %c0_i32 : i32, i32
  }
}

</mosaic_0001>

<bundles_post_ra>
// kernel: tpu_custom_call.1
= control target key start
LH: loop header
LB: loop body
LE: loop exit
PB: predicated region body
PF: predicated region fallthrough
CT: control target
= control target key end

     0   :  { %12 = vsyncpa [#allocation3], 0  ;;  %s369_s0 = inlined_call_operand.hbm [shape: f32[8,16], index: 0, kind: input, shape index: {}]   ;;  %s370_s1 = inlined_call_operand.hbm [shape: f32[16,32], index: 1, kind: input, shape index: {}]   ;;  %s371_s2 = inlined_call_operand.vmem [shape: f32[1,32], index: 2, kind: input, shape index: {}]   ;;  %s372_s3 = inlined_call_operand.vmem [shape: f32[1,32], index: 3, kind: input, shape index: {}]   ;;  %s373_s4 = inlined_call_operand.hbm [shape: f32[8,32], index: 4, kind: output, shape index: {0}]   ;;  %s374_s5 = inlined_call_operand.vmem [shape: f32[8,1], index: 5, kind: output, shape index: {1}]   ;;  %s375_s6 = inlined_call_operand.vmem [shape: f32[8,1], index: 6, kind: output, shape index: {2}]  }
   0x1   :  { %13 = vsyncpa [#allocation6], 0 }
   0x2   :  { %14 = vsyncpa [#allocation4], 0  ;;  %s271_s21 = smov [#allocation2]   ;;  %s272_s23 = smov [#allocation5]  }
   0x3   :  { %s21_s22 = sshll.u32 %s271_s21, 4  ;;  %s30_s24 = sshll.u32 %s272_s23, 4  ;;  %s22_s22 = int_to_ptr.vmem [resolvable:$true] %s21_s22  ;;  %s314_s24 = int_to_ptr.vmem [resolvable:$true] %s30_s24 }
   0x4   :  { %s199_s27 = scalar_lea.hbm %s369_s0, 128 }
   0x5   :  { %p200_p0 = scmp.ne.s32.totalorder %s369_s0, %s199_s27  ;;  %p203_p1 = scmp.lt.u32.totalorder %s199_s27, %s369_s0 }
   0x7   :  { %p205_p2 = pnand %p203_p1, %p200_p0 }
   0x9   :  { %208 = shalt.err (!%p205_p2)
}
   0xa   :  { %s209_s8 = scalar_lea.vmem %s22_s22, 128  ;;  %p214_p4 = scmp.lt.s32.totalorder %s22_s22, %s22_s22 }
   0xb   :  { %p210_p3 = scmp.ne.s32.totalorder %s22_s22, %s209_s8  ;;  %p215_p5 = scmp.lt.s32.totalorder %s209_s8, %s209_s8 }
   0xd   :  { %p216_p6 = por %p215_p5, %p214_p4 }
   0xf   :  { %p217_p7 = pnand %p216_p6, %p210_p3 }
  0x11   :  { %220 = shalt.err (!%p217_p7)
}
  0x12   :  { %24 = dma.hbm_to_vmem [thread:$0]  %s369_s0, 128, %s22_s22, [#allocation3]  }
  0x13   :  { %s221_s13 = scalar_lea.hbm %s370_s1, 256 }
  0x14   :  { %p222_p8 = scmp.ne.s32.totalorder %s370_s1, %s221_s13  ;;  %p225_p9 = scmp.lt.u32.totalorder %s221_s13, %s370_s1 }
  0x16   :  { %p227_p10 = pnand %p225_p9, %p222_p8 }
  0x18   :  { %230 = shalt.err (!%p227_p10)
}
  0x19   :  { %s231_s18 = scalar_lea.vmem %s314_s24, 256  ;;  %p236_p12 = scmp.lt.s32.totalorder %s314_s24, %s314_s24 }
  0x1a   :  { %p232_p11 = scmp.ne.s32.totalorder %s314_s24, %s231_s18  ;;  %p237_p13 = scmp.lt.s32.totalorder %s231_s18, %s231_s18 }
  0x1c   :  { %p238_p0 = por %p237_p13, %p236_p12 }
  0x1e   :  { %p239_p1 = pnand %p238_p0, %p232_p11 }
  0x20   :  { %242 = shalt.err (!%p239_p1)
}
  0x21   :  { %s273_s0 = smov 128   ;;  %s274_s19 = smov 8  }
  0x22   :  { %36 = dma.hbm_to_vmem [thread:$0]  %s370_s1, 256, %s314_s24, [#allocation6], %s273_s0, %s273_s0, %s274_s19  }
  0x23   :  { %265 = dma.done.wait [#allocation3], 128  }
  0x24   :  { %266 = vsyncadd [#allocation3], 4294967168 }
  0x25   :  { %267 = dma.done.wait [#allocation6], 256  }
  0x26   :  { %268 = vsyncadd [#allocation6], 4294967040  ;;  %v275_v0 = vmov 0.0|0.0   ;;  %vm276_vm0 = vmmov 0   ;;  %v277_v1 = vmov 0.0   ;;  %v48_v2 = vld [vmem:[#allocation5] sm:$0xff] }
  0x27   :  { %188 = vmatprep.subr.bf16.mxu0 %v275_v0  ;;  %185 = vmatprep.mubr.msk.f32.mxu0 %vm276_vm0, %v277_v1  ;;  %v49_v3 = vld [vmem:[#allocation5 + $0x8] sm:$0xff]  ;;  %v47_v5 = vld [vmem:[#allocation2] sm:$0xff]  ;;  %vm50_vm1 = vcmask 130048   ;;  %vm124_vm2 = vcmask 261120   ;;  %s278_s25 = smov [#allocation7]  }
  0x28   :  { %v189_v4 = vpack.c.bf16 %v49_v3, %v48_v2  ;;  %v176_v6 = vld [vmem:[%s371_s2] ss:$0 sm:$0xff]  ;;  %s157_s26 = sshll.u32 %s278_s25, 4  ;;  %s158_s26 = int_to_ptr.vmem [resolvable:$true] %s157_s26 }
  0x29   :  { %v177_v8 = vld [vmem:[%s372_s3] ss:$0 sm:$0xff]  ;;  %s243_s27 = scalar_lea.vmem %s158_s26, 128  ;;  %p248_p3 = scmp.lt.s32.totalorder %s158_s26, %s158_s26 }
  0x2a   :  { %190 = vmatpush3.bf16.msra.mxu0 %v189_v4  ;;  %p244_p2 = scmp.ne.s32.totalorder %s158_s26, %s243_s27  ;;  %p249_p4 = scmp.lt.s32.totalorder %s243_s27, %s243_s27 }
  0x2c   :  { %p250_p5 = por %p249_p4, %p248_p3 }
  0x2d   :  { %186 = vmatmul.mubr.msk.f32.vlgmr.msra.gmra.mrb[0].mxu0 %vm50_vm1, %v47_v5 }
  0x2e   :  { %p251_p6 = pnand %p250_p5, %p244_p2 }
 0x100   :  { %v120_v7 = vpop.f32.mrb[0].mxu0 }
 0x101   :  { %v187_v9 = vpop.f32.mrb[1].mxu0  ;;  %v133_v10 = vmul.f32 %v176_v6, %v120_v7  ;;  %125 = vst.msk [vmem:[#allocation7] sm:$0xff] %vm124_vm2, %v120_v7  ;;  %v146_v12 = vmul.f32 %v177_v8, %v120_v7 }
 0x103   :  { %v134_v11 = vsel %vm124_vm2, %v133_v10, 0.0  ;;  %v147_v13 = vsel %vm124_vm2, %v146_v12, 0.0 }
 0x104   :  { %135 = vadd.xlane.f32.xlu0 %v134_v11 }
 0x108   :  { %148 = vadd.xlane.f32.xlu0 %v147_v13 }
 0x109   :  { %254 = shalt.err (!%p251_p6)
}
 0x10a   :  { %s255_s28 = scalar_lea.hbm %s373_s4, 128 }
 0x10b   :  { %p256_p7 = scmp.ne.s32.totalorder %s373_s4, %s255_s28  ;;  %p259_p8 = scmp.lt.u32.totalorder %s255_s28, %s373_s4 }
 0x10d   :  { %p261_p9 = pnand %p259_p8, %p256_p7 }
 0x10f   :  { %264 = shalt.err (!%p261_p9)
}
 0x110   :  { %160 = dma.vmem_to_hbm [thread:$0]  %s158_s26, 128, %s373_s4, [#allocation4]   ;;  %vm137_vm3 = vcmask 7168  }
 0x191   :  { %v136_v14 = vpop.xlane.xlu0 %135 }
 0x192   :  { %138 = vst.msk [vmem:[%s374_s5] sm:$0xff] %vm137_vm3, %v136_v14 }
 0x195   :  { %v149_v15 = vpop.xlane.xlu0 %148 }
 0x196   :  { %150 = vst.msk [vmem:[%s375_s6] sm:$0xff] %vm137_vm3, %v149_v15 }
 0x197   :  { %269 = dma.done.wait [#allocation4], 128  }
 0x198   :  { %270 = vsyncadd [#allocation4], 4294967168 }
 0x199   :  { %172 = vsyncpa [#allocation3], 1 }
 0x19a   :  { %173 = vsyncpa [#allocation6], 1 }
 0x19b   :  { %174 = vsyncpa [#allocation4], 1 }

</bundles_post_ra>
